<compile_context>
chip_gen: v7x
topology: tpu7x:2x2x1
jax: 0.10.0
libtpu: 0.0.40
codegen_flags: <defaults>
</compile_context>

<pallas_src>
import functools

import jax
import jax.numpy as jnp
import numpy as np
from jax.experimental import pallas as pl
from jax.experimental.pallas import tpu as pltpu


# ---------------------------------------------------------------------------
# Scale mode: multiply-by-reciprocal only if bit-identical to true division
# for every possible uint8 value (exhaustive 256-value host check).
# ---------------------------------------------------------------------------
_SCALE_RECIP = np.float32(1.0 / 255.0)
_ALL_U8 = np.arange(256, dtype=np.float32)
_RECIP_EXACT = bool(
    np.array_equal(_ALL_U8 / np.float32(255.0), _ALL_U8 * _SCALE_RECIP)
)


def _scale(f32):
    if _RECIP_EXACT:
        return f32 * _SCALE_RECIP       # verified bit-identical; saves EUP/VPU ops
    return f32 / np.float32(255.0)      # exact PyTorch parity


# ---------------------------------------------------------------------------
# Per-generation VMEM sizing (never the full physical VMEM)
# ---------------------------------------------------------------------------
@functools.lru_cache(maxsize=1)
def _vmem_config():
    phys = None
    try:
        phys = getattr(pltpu.get_tpu_info(), "vmem_capacity_bytes", None)
    except Exception:
        phys = None
    if not phys or phys <= 0 or phys > 256 * 1024 * 1024:
        phys = 64 * 1024 * 1024                          # conservative: v7x per-TC
    limit = min(int(phys * 0.75), 112 * 1024 * 1024)     # ~48 MiB v7x, ~96 MiB v5e/v6e
    limit = max(limit, 32 * 1024 * 1024)
    budget = (limit * 2) // 3                            # ~32 MiB v7x, ~64 MiB v5e/v6e
    return limit, budget


# ---------------------------------------------------------------------------
# Tiling helper: even, balanced, VMEM-fitting row tiles for a 1-D parallel grid
# ---------------------------------------------------------------------------
def _pick_tile_rows(n_rows, bytes_per_row, row_align, budget):
    """Pick a row tile (multiple of row_align unless full-extent) so that:
    (a) one block's working set fits the VMEM budget, and
    (b) the grid has an EVEN number of balanced steps, so v7x's two
        TensorCores split the parallel axis evenly (no-op cost on 1-TC chips)."""
    bytes_per_row = max(1, bytes_per_row)
    budget_rows = max(row_align, (budget // bytes_per_row) // row_align * row_align)
    if n_rows <= row_align:
        return n_rows                              # single full-extent block
    max_steps = -(-n_rows // row_align)
    best_tile, best_score = None, None
    for steps in range(2, min(max_steps, 64) + 1, 2):
        tile_r = -(-n_rows // steps)
        tile_r = ((tile_r + row_align - 1) // row_align) * row_align
        if tile_r > budget_rows:
            continue                               # too big for VMEM budget
        actual = -(-n_rows // tile_r)
        if actual % 2:
            continue                               # odd step count -> 2-TC imbalance
        # Busier core handles actual/2 blocks of tile_r rows; '+ actual' biases
        # toward fewer grid steps (~0.35 us each) on ties.
        score = (actual // 2) * tile_r + actual
        if best_score is None or score < best_score:
            best_score, best_tile = score, tile_r
    if best_tile is not None:
        return best_tile
    # No balanced even split available: largest budget-fitting aligned tile.
    return n_rows if budget_rows >= n_rows else budget_rows


def _lane_dense_rows_lanes(rows0, cols0):
    total = rows0 * cols0
    if total % 128 == 0:
        return total // 128, 128                   # lane-dense, max row granularity
    # TODO(synk): H*W % 128 != 0 falls through to masked tail stores (correct,
    # up to ~2x store cost for pathological widths; common resolutions unaffected).
    return rows0, cols0


# ---------------------------------------------------------------------------
# Kernels
# ---------------------------------------------------------------------------
def _make_unpack_kernel(n_out):
    """Unpack n_out uint8 channels from packed-u32 pixels; store scaled f32
    channel planes.  Pure VPU work with minimal ops per channel."""
    def kernel(p_ref, o_ref):
        u = p_ref[...]                             # (tile_r, lanes) uint32
        for c in range(n_out):                     # static unroll (<= 4 iters)
            if c == 0:
                ch = u & jnp.uint32(0xFF)          # byte 0: mask only, no shift
            elif c == 3:
                ch = u >> 24                       # top byte: unsigned, no mask needed
            else:
                ch = (u >> (8 * c)) & jnp.uint32(0xFF)
            f = ch.astype(jnp.int32).astype(jnp.float32)   # cheap i32->f32 convert
            o_ref[c, :, :] = _scale(f)
    return kernel


def _cast_scale_kernel(x_ref, o_ref):
    # Lane-dense elementwise cast + scale (C == 1 and C > 4 paths).
    o_ref[...] = _scale(x_ref[...].astype(jnp.float32))


# ---------------------------------------------------------------------------
# Forward paths
# ---------------------------------------------------------------------------
def _forward_packed(x, n_out):
    H, W, Cin = x.shape
    if Cin < 4:
        # Cheap strided uint8 pad; avoids XLA's lane-hostile HWC->CHW transpose.
        x = jnp.pad(x, ((0, 0), (0, 0), (0, 4 - Cin)))
    packed = jax.lax.bitcast_convert_type(x, jnp.uint32)   # (H, W) uint32
    total = H * W
    rows, lanes = _lane_dense_rows_lanes(H, W)
    packed2d = packed.reshape(rows, lanes)                  # contiguous -> free
    limit, budget = _vmem_config()
    # per 2-D element: 2 x u32 in + 2 x (n_out f32) out (double-buffered) + temps
    bytes_per_row = lanes * (2 * 4 + 2 * n_out * 4 + 32)
    tile_r = _pick_tile_rows(rows, bytes_per_row, row_align=8, budget=budget)
    grid = (pl.cdiv(rows, tile_r),)
    cost = pl.CostEstimate(
        flops=n_out * total,
        transcendentals=0 if _RECIP_EXACT else n_out * total,
        bytes_accessed=4 * total + 4 * n_out * total,
    )
    out = pl.pallas_call(
        _make_unpack_kernel(n_out),
        out_shape=jax.ShapeDtypeStruct((n_out, rows, lanes), jnp.float32),
        grid_spec=pltpu.PrefetchScalarGridSpec(
            num_scalar_prefetch=0,
            grid=grid,
            in_specs=[pl.BlockSpec((tile_r, lanes), lambda i: (i, 0))],
            out_specs=pl.BlockSpec((n_out, tile_r, lanes), lambda i: (0, i, 0)),
        ),
        compiler_params=pltpu.CompilerParams(
            dimension_semantics=("parallel",),
            vmem_limit_bytes=limit,
        ),
        cost_estimate=cost,
    )(packed2d)
    return out.reshape(1, n_out, H, W)


def _forward_cast2d(x2d, out_shape4):
    rows0, cols0 = x2d.shape
    total = rows0 * cols0
    rows, lanes = _lane_dense_rows_lanes(rows0, cols0)
    x2d = x2d.reshape(rows, lanes)
    limit, budget = _vmem_config()
    bytes_per_row = lanes * (2 * 1 + 2 * 4 + 16)
    tile_r = _pick_tile_rows(rows, bytes_per_row, row_align=32, budget=budget)
    grid = (pl.cdiv(rows, tile_r),)
    cost = pl.CostEstimate(
        flops=total,
        transcendentals=0 if _RECIP_EXACT else total,
        bytes_accessed=total + 4 * total,
    )
    out = pl.pallas_call(
        _cast_scale_kernel,
        out_shape=jax.ShapeDtypeStruct((rows, lanes), jnp.float32),
        grid_spec=pltpu.PrefetchScalarGridSpec(
            num_scalar_prefetch=0,
            grid=grid,
            in_specs=[pl.BlockSpec((tile_r, lanes), lambda i: (i, 0))],
            out_specs=pl.BlockSpec((tile_r, lanes), lambda i: (i, 0)),
        ),
        compiler_params=pltpu.CompilerParams(
            dimension_semantics=("parallel",),
            vmem_limit_bytes=limit,
        ),
        cost_estimate=cost,
    )(x2d)
    return out.reshape(out_shape4)


def uint8_to_float_normed(x):
    """x: (H, W, C) uint8 -> (1, C, H, W) float32 == permute(2,0,1).float()/255."""
    H, W, C = x.shape
    if 2 <= C <= 4:
        return _forward_packed(x, C)
    if C == 1:
        # permute(2,0,1) of (H,W,1) is a pure reshape; cast + scale only.
        return _forward_cast2d(x.reshape(H, W), (1, 1, H, W))
    # C > 4 (rare): uint8 HWC->CHW permute in XLA, lane-dense cast in Pallas.
    x_chw = jnp.transpose(x, (2, 0, 1)).reshape(C * H, W)
    return _forward_cast2d(x_chw, (1, C, H, W))


if __name__ == "__main__":
    key = jax.random.PRNGKey(0)
    fwd = jax.jit(uint8_to_float_normed)

    for C in (4, 3):   # RGBA fast path + RGB pad-to-4 path (also checks endianness)
        H, W = 16, 16
        key, sub = jax.random.split(key)
        x = jax.random.randint(sub, (H, W, C), 0, 256, dtype=jnp.int32).astype(jnp.uint8)
        out = jax.block_until_ready(fwd(x))

        # Reference: mirrors the PyTorch forward exactly (IEEE f32 divide on host).
        x_np = np.asarray(x)
        ref = (x_np.transpose(2, 0, 1).astype(np.float32) / np.float32(255.0))[None]
        assert out.shape == (1, C, H, W) and out.dtype == jnp.float32
        np.testing.assert_allclose(np.asarray(out), ref, rtol=0, atol=1e-6)

    print("KERNEL_OK")
</pallas_src>

<mosaic_0001>
module attributes {stable_mosaic.version = 11 : i64} {
  func.func @kernel(%arg0: i32, %arg1: memref<2x128xi32, #tpu.memory_space<vmem>>, %arg2: memref<4x2x128xf32, #tpu.memory_space<vmem>>) attributes {dimension_semantics = [#tpu.dimension_semantics<parallel>], iteration_bounds = array<i64: 1>, scalar_prefetch = 0 : i64, scratch_operands = 0 : i64, tpu.core_type = #tpu.core_type<tc>, window_params = [{transform_indices = @transform_0, window_bounds = array<i64: 2, 128>}, {transform_indices = @transform_1, window_bounds = array<i64: 4, 2, 128>}]} {
    %c0 = arith.constant 0 : index
    %c0_0 = arith.constant 0 : index
    %0 = vector.load %arg1[%c0, %c0_0] : memref<2x128xi32, #tpu.memory_space<vmem>>, vector<2x128xi32>
    %c255_i32 = arith.constant 255 : i32
    %1 = vector.broadcast %c255_i32 : i32 to vector<2x128xi32>
    %2 = arith.andi %0, %1 : vector<2x128xi32>
    %3 = arith.sitofp %2 : vector<2x128xi32> to vector<2x128xf32>
    %cst = arith.constant 2.550000e+02 : f32
    %4 = vector.broadcast %cst : f32 to vector<2x128xf32>
    %5 = arith.divf %3, %4 : vector<2x128xf32>
    %c0_1 = arith.constant 0 : index
    %c0_2 = arith.constant 0 : index
    %c0_3 = arith.constant 0 : index
    %6 = vector.load %arg2[%c0_1, %c0_2, %c0_3] : memref<4x2x128xf32, #tpu.memory_space<vmem>>, vector<1x2x128xf32>
    %7 = vector.shape_cast %6 : vector<1x2x128xf32> to vector<2x128xf32>
    %8 = vector.shape_cast %5 : vector<2x128xf32> to vector<1x2x128xf32>
    tpu.vector_store %arg2[%c0_1, %c0_2, %c0_3], %8 {strides = array<i32>} : memref<4x2x128xf32, #tpu.memory_space<vmem>>, vector<1x2x128xf32>,
    %c8_i32 = arith.constant 8 : i32
    %9 = vector.broadcast %c8_i32 : i32 to vector<2x128xi32>
    %10 = arith.shrui %0, %9 : vector<2x128xi32>
    %c255_i32_4 = arith.constant 255 : i32
    %11 = vector.broadcast %c255_i32_4 : i32 to vector<2x128xi32>
    %12 = arith.andi %10, %11 : vector<2x128xi32>
    %13 = arith.sitofp %12 : vector<2x128xi32> to vector<2x128xf32>
    %cst_5 = arith.constant 2.550000e+02 : f32
    %14 = vector.broadcast %cst_5 : f32 to vector<2x128xf32>
    %15 = arith.divf %13, %14 : vector<2x128xf32>
    %c1 = arith.constant 1 : index
    %c0_6 = arith.constant 0 : index
    %c0_7 = arith.constant 0 : index
    %16 = vector.load %arg2[%c1, %c0_6, %c0_7] : memref<4x2x128xf32, #tpu.memory_space<vmem>>, vector<1x2x128xf32>
    %17 = vector.shape_cast %16 : vector<1x2x128xf32> to vector<2x128xf32>
    %18 = vector.shape_cast %15 : vector<2x128xf32> to vector<1x2x128xf32>
    tpu.vector_store %arg2[%c1, %c0_6, %c0_7], %18 {strides = array<i32>} : memref<4x2x128xf32, #tpu.memory_space<vmem>>, vector<1x2x128xf32>,
    %c16_i32 = arith.constant 16 : i32
    %19 = vector.broadcast %c16_i32 : i32 to vector<2x128xi32>
    %20 = arith.shrui %0, %19 : vector<2x128xi32>
    %c255_i32_8 = arith.constant 255 : i32
    %21 = vector.broadcast %c255_i32_8 : i32 to vector<2x128xi32>
    %22 = arith.andi %20, %21 : vector<2x128xi32>
    %23 = arith.sitofp %22 : vector<2x128xi32> to vector<2x128xf32>
    %cst_9 = arith.constant 2.550000e+02 : f32
    %24 = vector.broadcast %cst_9 : f32 to vector<2x128xf32>
    %25 = arith.divf %23, %24 : vector<2x128xf32>
    %c2 = arith.constant 2 : index
    %c0_10 = arith.constant 0 : index
    %c0_11 = arith.constant 0 : index
    %26 = vector.load %arg2[%c2, %c0_10, %c0_11] : memref<4x2x128xf32, #tpu.memory_space<vmem>>, vector<1x2x128xf32>
    %27 = vector.shape_cast %26 : vector<1x2x128xf32> to vector<2x128xf32>
    %28 = vector.shape_cast %25 : vector<2x128xf32> to vector<1x2x128xf32>
    tpu.vector_store %arg2[%c2, %c0_10, %c0_11], %28 {strides = array<i32>} : memref<4x2x128xf32, #tpu.memory_space<vmem>>, vector<1x2x128xf32>,
    %c24_i32 = arith.constant 24 : i32
    %29 = vector.broadcast %c24_i32 : i32 to vector<2x128xi32>
    %30 = arith.shrui %0, %29 : vector<2x128xi32>
    %31 = arith.sitofp %30 : vector<2x128xi32> to vector<2x128xf32>
    %cst_12 = arith.constant 2.550000e+02 : f32
    %32 = vector.broadcast %cst_12 : f32 to vector<2x128xf32>
    %33 = arith.divf %31, %32 : vector<2x128xf32>
    %c3 = arith.constant 3 : index
    %c0_13 = arith.constant 0 : index
    %c0_14 = arith.constant 0 : index
    %34 = vector.load %arg2[%c3, %c0_13, %c0_14] : memref<4x2x128xf32, #tpu.memory_space<vmem>>, vector<1x2x128xf32>
    %35 = vector.shape_cast %34 : vector<1x2x128xf32> to vector<2x128xf32>
    %36 = vector.shape_cast %33 : vector<2x128xf32> to vector<1x2x128xf32>
    tpu.vector_store %arg2[%c3, %c0_13, %c0_14], %36 {strides = array<i32>} : memref<4x2x128xf32, #tpu.memory_space<vmem>>, vector<1x2x128xf32>,
    return
  }
  func.func @transform_0(%arg0: i32) -> (i32, i32) {
    %c0_i32 = arith.constant 0 : i32
    %c0_i32_0 = arith.constant 0 : i32
    return %arg0, %c0_i32 : i32, i32
  }
  func.func @transform_1(%arg0: i32) -> (i32, i32, i32) {
    %c0_i32 = arith.constant 0 : i32
    %c0_i32_0 = arith.constant 0 : i32
    %c0_i32_1 = arith.constant 0 : i32
    return %c0_i32, %arg0, %c0_i32_0 : i32, i32, i32
  }
}

</mosaic_0001>

<bundles_post_ra>
// kernel: uint8_to_float_normed.1
= control target key start
LH: loop header
LB: loop body
LE: loop exit
PB: predicated region body
PF: predicated region fallthrough
CT: control target
= control target key end

     0   :  { %s63_s0 = inlined_call_operand.vmem [shape: u32[2,128], index: 0, kind: input, shape index: {}]   ;;  %s64_s1 = inlined_call_operand.vmem [shape: f32[4,2,128], index: 1, kind: output, shape index: {}]  }
   0x1   :  { %v8_v0 = vld [vmem:[%s63_s0] sm:$0x3] }
   0x2   :  { %v9_v1 = vand.u32 255, %v8_v0  ;;  %v14_v2 = vshrl.u32 %v8_v0, 8  ;;  %v20_v3 = vshrl.u32 %v8_v0, 16  ;;  %v26_v4 = vshrl.u32 %v8_v0, 24 }
   0x4   :  { %v10_v5 = vcvt.s32.f32 %v9_v1  ;;  %v15_v6 = vand.u32 255, %v14_v2  ;;  %v21_v7 = vand.u32 255, %v20_v3  ;;  %v27_v8 = vcvt.s32.f32 %v26_v4 }
   0x6   :  { %v12_v9 = vmul.f32 0.003921569, %v10_v5  ;;  %v16_v10 = vcvt.s32.f32 %v15_v6  ;;  %v22_v11 = vcvt.s32.f32 %v21_v7  ;;  %v28_v12 = vmul.f32 0.003921569, %v27_v8 }
   0x8   :  { %13 = vst [vmem:[%s64_s1] sm:$0x3] %v12_v9  ;;  %v17_v13 = vmul.f32 0.003921569, %v16_v10  ;;  %v23_v14 = vmul.f32 0.003921569, %v22_v11 }
   0x9   :  { %37 = vst [vmem:[%s64_s1 + $0x6] sm:$0x3] %v28_v12 }
   0xa   :  { %35 = vst [vmem:[%s64_s1 + $0x2] sm:$0x3] %v17_v13  ;;  %36 = vst [vmem:[%s64_s1 + $0x4] sm:$0x3] %v23_v14 }

</bundles_post_ra>
